<compile_context>
chip_gen: v7x
topology: tpu7x:2x2x1
jax: 0.10.0
libtpu: 0.0.40
codegen_flags: <defaults>
</compile_context>

<pallas_src>
import functools

import jax
import jax.numpy as jnp
from jax.experimental import pallas as pl
from jax.experimental.pallas import tpu as pltpu

LANE = 128


def _round_up(n, m):
    return ((n + m - 1) // m) * m


def pg_forward_kernel(x_ref, w1_ref, b1_ref, w2_ref, b2_ref, out_ref, *, out_size):
    x = x_ref[...]                                   # (TB, I)   f32 or bf16
    w1 = w1_ref[...]                                 # (I, Hp)
    w2 = w2_ref[...]                                 # (Hp, Op)

    # fc1 + ReLU (MXU accumulates in f32; epilogue strictly f32)
    h = jnp.dot(x, w1, preferred_element_type=jnp.float32)          # (TB, Hp)
    h = jnp.maximum(h + b1_ref[...], 0.0)

    # fc2
    logits = jnp.dot(h.astype(w2.dtype), w2,
                     preferred_element_type=jnp.float32)            # (TB, Op)
    logits = logits + b2_ref[...]

    # Mask zero-padded action columns so they carry no probability mass.
    if logits.shape[-1] > out_size:
        col = jax.lax.broadcasted_iota(jnp.int32, logits.shape, dimension=1)
        logits = jnp.where(col < out_size, logits, -1e30)

    # Numerically stable softmax over actions.
    m = jnp.max(logits, axis=-1, keepdims=True)
    e = jnp.exp(logits - m)
    denom = jnp.sum(e, axis=-1, keepdims=True)
    # approx=False keeps sum(probs)==1 within 1e-5 (see review note).
    out_ref[...] = (e * pl.reciprocal(denom, approx=False)).astype(out_ref.dtype)


def pg_network_forward(x, w1, b1, w2, b2, *, block_batch=512, mxu_dtype=None):
    """Forward pass. x:(B,I); w1:(I,H); b1:(1,H); w2:(H,O); b2:(1,O). Returns (B,O) f32.

    mxu_dtype=jnp.bfloat16 feeds bf16 to the MXU (halves HBM read traffic on
    v6e/v7x); epilogue stays f32.
    """
    batch, in_size = x.shape
    hidden = w1.shape[1]
    out_size = w2.shape[1]
    hp = _round_up(hidden, LANE)
    op = _round_up(out_size, LANE)

    b1 = jnp.asarray(b1, jnp.float32).reshape(1, -1)
    b2 = jnp.asarray(b2, jnp.float32).reshape(1, -1)

    # Lane-dense, zero-padded parameters (KB-scale; done in the wrapper).
    w1p = jnp.pad(w1, ((0, 0), (0, hp - hidden)))
    b1p = jnp.pad(b1, ((0, 0), (0, hp - hidden)))
    w2p = jnp.pad(w2, ((0, hp - hidden), (0, op - out_size)))
    b2p = jnp.pad(b2, ((0, 0), (0, op - out_size)))

    if mxu_dtype is not None:
        x = x.astype(mxu_dtype)
        w1p = w1p.astype(mxu_dtype)
        w2p = w2p.astype(mxu_dtype)

    # Batch tile: full array if it fits, else block_batch (multiple of 8).
    tb = batch if batch <= block_batch else block_batch
    grid = (pl.cdiv(batch, tb),)

    cost = pl.CostEstimate(
        flops=2 * batch * (in_size * hp + hp * op),
        transcendentals=batch * op,
        bytes_accessed=int(x.size * x.dtype.itemsize
                           + w1p.size * w1p.dtype.itemsize
                           + w2p.size * w2p.dtype.itemsize
                           + b1p.size * 4 + b2p.size * 4
                           + batch * op * 4),
    )

    out_padded = pl.pallas_call(
        functools.partial(pg_forward_kernel, out_size=out_size),
        out_shape=jax.ShapeDtypeStruct((batch, op), jnp.float32),
        grid=grid,
        in_specs=[
            pl.BlockSpec((tb, in_size), lambda i: (i, 0)),
            pl.BlockSpec((in_size, hp), lambda i: (0, 0)),   # weights resident
            pl.BlockSpec((1, hp), lambda i: (0, 0)),
            pl.BlockSpec((hp, op), lambda i: (0, 0)),
            pl.BlockSpec((1, op), lambda i: (0, 0)),
        ],
        out_specs=pl.BlockSpec((tb, op), lambda i: (i, 0)),
        compiler_params=pltpu.CompilerParams(
            dimension_semantics=("parallel",),               # v7x: shard batch over 2 TCs
        ),
        cost_estimate=cost,
    )(x, w1p, b1p, w2p, b2p)

    return out_padded[:, :out_size]


def init_params(key, input_size, hidden_size, output_size):
    # Deterministic init mimicking torch.nn.Linear default:
    # U(-1/sqrt(fan_in), 1/sqrt(fan_in)) for both weight and bias.
    k1, k2, k3, k4 = jax.random.split(key, 4)
    bound1 = 1.0 / jnp.sqrt(jnp.float32(input_size))
    bound2 = 1.0 / jnp.sqrt(jnp.float32(hidden_size))
    w1 = jax.random.uniform(k1, (input_size, hidden_size), jnp.float32, -bound1, bound1)
    b1 = jax.random.uniform(k2, (1, hidden_size), jnp.float32, -bound1, bound1)
    w2 = jax.random.uniform(k3, (hidden_size, output_size), jnp.float32, -bound2, bound2)
    b2 = jax.random.uniform(k4, (1, output_size), jnp.float32, -bound2, bound2)
    return w1, b1, w2, b2


def _reference(x, w1, b1, w2, b2):
    h = jnp.maximum(x @ w1 + b1, 0.0)
    return jax.nn.softmax(h @ w2 + b2, axis=-1)


if __name__ == "__main__":
    input_size, hidden_size, output_size = 16, 32, 4

    key = jax.random.PRNGKey(0)
    kx, kp, kx2 = jax.random.split(key, 3)
    w1, b1, w2, b2 = init_params(kp, input_size, hidden_size, output_size)

    # --- small single-tile run (f32, tight tolerance) ---
    batch = 8
    x = jax.random.normal(kx, (batch, input_size), dtype=jnp.float32)
    out = jax.block_until_ready(pg_network_forward(x, w1, b1, w2, b2))
    ref = _reference(x, w1, b1, w2, b2)
    assert out.shape == (batch, output_size)
    assert jnp.allclose(out, ref, atol=1e-5, rtol=1e-5)
    assert jnp.allclose(jnp.sum(out, axis=-1), 1.0, atol=1e-5)

    # --- multi-tile batch grid (f32): grid=(4,), weights stay resident ---
    batch2 = 512
    x2 = jax.random.normal(kx2, (batch2, input_size), dtype=jnp.float32)
    out2 = jax.block_until_ready(
        pg_network_forward(x2, w1, b1, w2, b2, block_batch=128))
    ref2 = _reference(x2, w1, b1, w2, b2)
    assert out2.shape == (batch2, output_size)
    assert jnp.allclose(out2, ref2, atol=1e-5, rtol=1e-5)
    assert jnp.allclose(jnp.sum(out2, axis=-1), 1.0, atol=1e-5)

    # --- bf16 MXU path (f32 epilogue), looser tolerance vs f32 reference ---
    out3 = jax.block_until_ready(
        pg_network_forward(x2, w1, b1, w2, b2, block_batch=128,
                           mxu_dtype=jnp.bfloat16))
    assert out3.shape == (batch2, output_size)
    assert jnp.allclose(out3, ref2, atol=5e-2)
    assert jnp.allclose(jnp.sum(out3, axis=-1), 1.0, atol=1e-4)

    print("KERNEL_OK")
</pallas_src>

<mosaic_0001>
module attributes {stable_mosaic.version = 11 : i64} {
  func.func @pg_forward_kernel(%arg0: i32, %arg1: memref<8x16xf32, #tpu.memory_space<vmem>>, %arg2: memref<16x128xf32, #tpu.memory_space<vmem>>, %arg3: memref<1x128xf32, #tpu.memory_space<vmem>>, %arg4: memref<128x128xf32, #tpu.memory_space<vmem>>, %arg5: memref<1x128xf32, #tpu.memory_space<vmem>>, %arg6: memref<8x128xf32, #tpu.memory_space<vmem>>) attributes {dimension_semantics = [#tpu.dimension_semantics<parallel>], iteration_bounds = array<i64: 1>, scalar_prefetch = 0 : i64, scratch_operands = 0 : i64, tpu.core_type = #tpu.core_type<tc>, window_params = [{transform_indices = @transform_0, window_bounds = array<i64: 8, 16>}, {pipeline_mode = #tpu.pipeline_mode<synchronous>, transform_indices = @transform_1, window_bounds = array<i64: 16, 128>}, {pipeline_mode = #tpu.pipeline_mode<synchronous>, transform_indices = @transform_2, window_bounds = array<i64: 1, 128>}, {pipeline_mode = #tpu.pipeline_mode<synchronous>, transform_indices = @transform_3, window_bounds = array<i64: 128, 128>}, {pipeline_mode = #tpu.pipeline_mode<synchronous>, transform_indices = @transform_4, window_bounds = array<i64: 1, 128>}, {transform_indices = @transform_5, window_bounds = array<i64: 8, 128>}]} {
    %c0 = arith.constant 0 : index
    %c0_0 = arith.constant 0 : index
    %0 = vector.load %arg1[%c0, %c0_0] : memref<8x16xf32, #tpu.memory_space<vmem>>, vector<8x16xf32>
    %c0_1 = arith.constant 0 : index
    %c0_2 = arith.constant 0 : index
    %1 = vector.load %arg2[%c0_1, %c0_2] : memref<16x128xf32, #tpu.memory_space<vmem>>, vector<16x128xf32>
    %c0_3 = arith.constant 0 : index
    %c0_4 = arith.constant 0 : index
    %2 = vector.load %arg4[%c0_3, %c0_4] : memref<128x128xf32, #tpu.memory_space<vmem>>, vector<128x128xf32>
    %cst = arith.constant dense<0.000000e+00> : vector<8x128xf32>
    %3 = tpu.matmul %0, %1, %cst {dimension_numbers = #tpu.dot_dimension_numbers<[1], [0], [0], [1], [0, 0, 1, 1], [], []>} : vector<8x16xf32>, vector<16x128xf32>, vector<8x128xf32> -> vector<8x128xf32>
    %c0_5 = arith.constant 0 : index
    %c0_6 = arith.constant 0 : index
    %4 = vector.load %arg3[%c0_5, %c0_6] : memref<1x128xf32, #tpu.memory_space<vmem>>, vector<1x128xf32>
    %5 = vector.broadcast %4 : vector<1x128xf32> to vector<8x128xf32>
    %6 = arith.addf %3, %5 : vector<8x128xf32>
    %cst_7 = arith.constant 0.000000e+00 : f32
    %7 = vector.broadcast %cst_7 : f32 to vector<8x128xf32>
    %8 = arith.maximumf %6, %7 : vector<8x128xf32>
    %cst_8 = arith.constant dense<0.000000e+00> : vector<8x128xf32>
    %9 = tpu.matmul %8, %2, %cst_8 {dimension_numbers = #tpu.dot_dimension_numbers<[1], [0], [0], [1], [0, 0, 1, 1], [], []>} : vector<8x128xf32>, vector<128x128xf32>, vector<8x128xf32> -> vector<8x128xf32>
    %c0_9 = arith.constant 0 : index
    %c0_10 = arith.constant 0 : index
    %10 = vector.load %arg5[%c0_9, %c0_10] : memref<1x128xf32, #tpu.memory_space<vmem>>, vector<1x128xf32>
    %11 = vector.broadcast %10 : vector<1x128xf32> to vector<8x128xf32>
    %12 = arith.addf %9, %11 : vector<8x128xf32>
    %13 = tpu.iota {dimensions = array<i32: 1>} : vector<8x128xi32>
    %c4_i32 = arith.constant 4 : i32
    %14 = vector.broadcast %c4_i32 : i32 to vector<8x128xi32>
    %15 = arith.cmpi slt, %13, %14 : vector<8x128xi32>
    %cst_11 = arith.constant -1.000000e+30 : f32
    %16 = vector.broadcast %cst_11 : f32 to vector<8x128xf32>
    %17 = arith.select %15, %12, %16 : vector<8x128xi1>, vector<8x128xf32>
    %cst_12 = arith.constant dense<0xFF800000> : vector<8xf32>
    %18 = vector.multi_reduction <maximumf>, %17, %cst_12 [1] : vector<8x128xf32> to vector<8xf32>
    %19 = vector.shape_cast %18 : vector<8xf32> to vector<8x1xf32>
    %20 = vector.broadcast %19 : vector<8x1xf32> to vector<8x128xf32>
    %21 = arith.subf %17, %20 : vector<8x128xf32>
    %22 = math.exp %21 : vector<8x128xf32>
    %cst_13 = arith.constant dense<0.000000e+00> : vector<8xf32>
    %23 = vector.multi_reduction <add>, %22, %cst_13 [1] : vector<8x128xf32> to vector<8xf32>
    %24 = vector.shape_cast %23 : vector<8xf32> to vector<8x1xf32>
    %25 = tpu.reciprocal %24 : vector<8x1xf32> -> vector<8x1xf32>
    %26 = vector.broadcast %25 : vector<8x1xf32> to vector<8x128xf32>
    %27 = arith.mulf %22, %26 : vector<8x128xf32>
    %c0_14 = arith.constant 0 : index
    %c0_15 = arith.constant 0 : index
    %28 = vector.load %arg6[%c0_14, %c0_15] : memref<8x128xf32, #tpu.memory_space<vmem>>, vector<8x128xf32>
    tpu.vector_store %arg6[%c0_14, %c0_15], %27 {strides = array<i32>} : memref<8x128xf32, #tpu.memory_space<vmem>>, vector<8x128xf32>,
    return
  }
  func.func @transform_0(%arg0: i32) -> (i32, i32) {
    %c0_i32 = arith.constant 0 : i32
    %c0_i32_0 = arith.constant 0 : i32
    return %arg0, %c0_i32 : i32, i32
  }
  func.func @transform_1(%arg0: i32) -> (i32, i32) {
    %c0_i32 = arith.constant 0 : i32
    %c0_i32_0 = arith.constant 0 : i32
    %c0_i32_1 = arith.constant 0 : i32
    return %c0_i32, %c0_i32_0 : i32, i32
  }
  func.func @transform_2(%arg0: i32) -> (i32, i32) {
    %c0_i32 = arith.constant 0 : i32
    %c0_i32_0 = arith.constant 0 : i32
    %c0_i32_1 = arith.constant 0 : i32
    return %c0_i32, %c0_i32_0 : i32, i32
  }
  func.func @transform_3(%arg0: i32) -> (i32, i32) {
    %c0_i32 = arith.constant 0 : i32
    %c0_i32_0 = arith.constant 0 : i32
    %c0_i32_1 = arith.constant 0 : i32
    return %c0_i32, %c0_i32_0 : i32, i32
  }
  func.func @transform_4(%arg0: i32) -> (i32, i32) {
    %c0_i32 = arith.constant 0 : i32
    %c0_i32_0 = arith.constant 0 : i32
    %c0_i32_1 = arith.constant 0 : i32
    return %c0_i32, %c0_i32_0 : i32, i32
  }
  func.func @transform_5(%arg0: i32) -> (i32, i32) {
    %c0_i32 = arith.constant 0 : i32
    %c0_i32_0 = arith.constant 0 : i32
    return %arg0, %c0_i32 : i32, i32
  }
}

</mosaic_0001>

<bundles_post_ra>
// kernel: tpu_custom_call.1
= control target key start
LH: loop header
LB: loop body
LE: loop exit
PB: predicated region body
PF: predicated region fallthrough
CT: control target
= control target key end

     0   :  { %10 = vsyncpa [#allocation3], 0  ;;  %s566_s0 = inlined_call_operand.hbm [shape: f32[8,16], index: 0, kind: input, shape index: {}]   ;;  %s567_s1 = inlined_call_operand.hbm [shape: f32[16,128], index: 1, kind: input, shape index: {}]   ;;  %s568_s2 = inlined_call_operand.vmem [shape: f32[1,128], index: 2, kind: input, shape index: {}]   ;;  %s569_s3 = inlined_call_operand.hbm [shape: f32[128,128], index: 3, kind: input, shape index: {}]   ;;  %s570_s4 = inlined_call_operand.vmem [shape: f32[1,128], index: 4, kind: input, shape index: {}]   ;;  %s571_s5 = inlined_call_operand.hbm [shape: f32[8,128], index: 5, kind: output, shape index: {}]  }
   0x1   :  { %11 = vsyncpa [#allocation6], 0 }
   0x2   :  { %12 = vsyncpa [#allocation4], 0  ;;  %s467_s18 = smov [#allocation5]   ;;  %s373_s22 = scalar_lea.hbm %s567_s1, 256 }
   0x3   :  { %s28_s19 = sshll.u32 %s467_s18, 4  ;;  %p374_p0 = scmp.ne.s32.totalorder %s567_s1, %s373_s22  ;;  %s29_s19 = int_to_ptr.vmem [resolvable:$true] %s28_s19 }
   0x4   :  { %p377_p1 = scmp.lt.u32.totalorder %s373_s22, %s567_s1 }
   0x6   :  { %p379_p2 = pnand %p377_p1, %p374_p0 }
   0x8   :  { %382 = shalt.err (!%p379_p2)
}
   0x9   :  { %s383_s27 = scalar_lea.vmem %s29_s19, 256  ;;  %p388_p4 = scmp.lt.s32.totalorder %s29_s19, %s29_s19 }
   0xa   :  { %p384_p3 = scmp.ne.s32.totalorder %s29_s19, %s383_s27  ;;  %p389_p5 = scmp.lt.s32.totalorder %s383_s27, %s383_s27 }
   0xc   :  { %p390_p6 = por %p389_p5, %p388_p4 }
   0xe   :  { %p391_p7 = pnand %p390_p6, %p384_p3 }
  0x10   :  { %394 = shalt.err (!%p391_p7)
}
  0x11   :  { %s468_s28 = smov 128   ;;  %s469_s29 = smov 8  }
  0x12   :  { %34 = dma.hbm_to_vmem [thread:$0]  %s567_s1, 256, %s29_s19, [#allocation6], %s468_s28, %s468_s28, %s469_s29  }
  0x13   :  { %s470_s7 = smov [#allocation2]   ;;  %s471_s9 = smov [#allocation7]  }
  0x14   :  { %s19_s8 = sshll.u32 %s470_s7, 4  ;;  %s42_s10 = sshll.u32 %s471_s9, 4  ;;  %s20_s8 = int_to_ptr.vmem [resolvable:$true] %s19_s8  ;;  %s43_s10 = int_to_ptr.vmem [resolvable:$true] %s42_s10 }
  0x15   :  { %s395_s13 = scalar_lea.hbm %s566_s0, 128 }
  0x16   :  { %p396_p8 = scmp.ne.s32.totalorder %s566_s0, %s395_s13  ;;  %p399_p9 = scmp.lt.u32.totalorder %s395_s13, %s566_s0 }
  0x18   :  { %p401_p10 = pnand %p399_p9, %p396_p8 }
  0x1a   :  { %404 = shalt.err (!%p401_p10)
}
  0x1b   :  { %s405_s1 = scalar_lea.vmem %s20_s8, 128  ;;  %p410_p12 = scmp.lt.s32.totalorder %s20_s8, %s20_s8 }
  0x1c   :  { %p406_p11 = scmp.ne.s32.totalorder %s20_s8, %s405_s1  ;;  %p411_p13 = scmp.lt.s32.totalorder %s405_s1, %s405_s1 }
  0x1e   :  { %p412_p0 = por %p411_p13, %p410_p12 }
  0x20   :  { %p413_p1 = pnand %p412_p0, %p406_p11 }
  0x22   :  { %416 = shalt.err (!%p413_p1)
}
  0x23   :  { %22 = dma.hbm_to_vmem [thread:$0]  %s566_s0, 128, %s20_s8, [#allocation3]  }
  0x24   :  { %s417_s22 = scalar_lea.hbm %s569_s3, 2048 }
  0x25   :  { %p418_p2 = scmp.ne.s32.totalorder %s569_s3, %s417_s22  ;;  %p421_p3 = scmp.lt.u32.totalorder %s417_s22, %s569_s3 }
  0x27   :  { %p423_p4 = pnand %p421_p3, %p418_p2 }
  0x29   :  { %426 = shalt.err (!%p423_p4)
}
  0x2a   :  { %s427_s27 = scalar_lea.vmem %s43_s10, 2048  ;;  %p432_p6 = scmp.lt.s32.totalorder %s43_s10, %s43_s10 }
  0x2b   :  { %p428_p5 = scmp.ne.s32.totalorder %s43_s10, %s427_s27  ;;  %p433_p7 = scmp.lt.s32.totalorder %s427_s27, %s427_s27 }
  0x2d   :  { %p434_p8 = por %p433_p7, %p432_p6 }
  0x2f   :  { %p435_p9 = pnand %p434_p8, %p428_p5 }
  0x31   :  { %438 = shalt.err (!%p435_p9)
}
  0x32   :  { %48 = dma.hbm_to_vmem [thread:$0]  %s569_s3, 2048, %s43_s10, [#allocation6], %s468_s28, %s468_s28, %s469_s29  }
  0x33   :  { %461 = dma.done.wait [#allocation3], 128  }
  0x34   :  { %462 = vsyncadd [#allocation3], 4294967168 }
  0x35   :  { %463 = dma.done.wait [#allocation6], 2304  }
  0x36   :  { %464 = vsyncadd [#allocation6], 4294964992  ;;  %v472_v0 = vmov 0.0|0.0   ;;  %vm473_vm0 = vmmov 0   ;;  %v474_v1 = vmov 0.0   ;;  %v61_v2 = vld [vmem:[#allocation5] sm:$0xff]  ;;  %v238_v35 = vlaneseq }
  0x37   :  { %333 = vmatprep.subr.bf16.mxu0 %v472_v0  ;;  %295 = vmatprep.mubr.msk.f32.mxu0 %vm473_vm0, %v474_v1  ;;  %v62_v3 = vld [vmem:[#allocation5 + $0x8] sm:$0xff]  ;;  %v63_v5 = vld [vmem:[#allocation7] sm:$0xff]  ;;  %v64_v6 = vld [vmem:[#allocation7 + $0x8] sm:$0xff]  ;;  %vm86_vm1 = vcmask 130048  }
  0x38   :  { %336 = vmatprep.subr.bf16.mxu1 %v472_v0  ;;  %330 = vmatprep.mubr.msk.f32.mxu1 %vm473_vm0, %v474_v1  ;;  %v334_v4 = vpack.c.bf16 %v62_v3, %v61_v2  ;;  %v65_v7 = vld [vmem:[#allocation7 + $0x10] sm:$0xff]  ;;  %v337_v8 = vpack.c.bf16 %v64_v6, %v63_v5  ;;  %v66_v9 = vld [vmem:[#allocation7 + $0x18] sm:$0xff]  ;;  %v60_v10 = vld [vmem:[#allocation2] sm:$0xff]  ;;  %v239_v36 = vand.u32 127, %v238_v35 }
  0x39   :  { %v340_v11 = vpack.c.bf16 %v66_v9, %v65_v7  ;;  %v67_v12 = vld [vmem:[#allocation7 + $0x20] sm:$0xff]  ;;  %v68_v13 = vld [vmem:[#allocation7 + $0x28] sm:$0xff]  ;;  %v69_v15 = vld [vmem:[#allocation7 + $0x30] sm:$0xff] }
  0x3a   :  { %335 = vmatpush3.bf16.msra.mxu0 %v334_v4  ;;  %338 = vmatpush3.bf16.msra.mxu1 %v337_v8  ;;  %v343_v14 = vpack.c.bf16 %v68_v13, %v67_v12  ;;  %v70_v16 = vld [vmem:[#allocation7 + $0x38] sm:$0xff]  ;;  %v71_v18 = vld [vmem:[#allocation7 + $0x40] sm:$0xff]  ;;  %v72_v19 = vld [vmem:[#allocation7 + $0x48] sm:$0xff]  ;;  %vm240_vm2 = vcmp.lt.s32.totalorder %v239_v36, 4 }
  0x3b   :  { %339 = vmatprep.subr.bf16.mxu1 %v472_v0  ;;  %v346_v17 = vpack.c.bf16 %v70_v16, %v69_v15  ;;  %v349_v20 = vpack.c.bf16 %v72_v19, %v71_v18  ;;  %v73_v21 = vld [vmem:[#allocation7 + $0x50] sm:$0xff]  ;;  %v74_v22 = vld [vmem:[#allocation7 + $0x58] sm:$0xff]  ;;  %v75_v24 = vld [vmem:[#allocation7 + $0x60] sm:$0xff] }
  0x3c   :  { %v352_v23 = vpack.c.bf16 %v74_v22, %v73_v21  ;;  %v76_v25 = vld [vmem:[#allocation7 + $0x68] sm:$0xff]  ;;  %v77_v27 = vld [vmem:[#allocation7 + $0x70] sm:$0xff]  ;;  %v78_v28 = vld [vmem:[#allocation7 + $0x78] sm:$0xff] }
  0x3d   :  { %296 = vmatmul.mubr.msk.f32.vlgmr.msra.gmra.mrb[0].mxu0 %vm86_vm1, %v60_v10  ;;  %v355_v26 = vpack.c.bf16 %v76_v25, %v75_v24  ;;  %v358_v29 = vpack.c.bf16 %v78_v28, %v77_v27  ;;  %v268_v30 = vld [vmem:[%s568_s2] ss:$0 sm:$0xff]  ;;  %s475_s2 = smov [#allocation8]  }
  0x3e   :  { %341 = vmatpush3.bf16.msra.mxu1 %v340_v11  ;;  %v270_v37 = vld [vmem:[%s570_s4] ss:$0 sm:$0xff]  ;;  %s258_s7 = sshll.u32 %s475_s2, 4  ;;  %s259_s7 = int_to_ptr.vmem [resolvable:$true] %s258_s7 }
  0x3f   :  { %342 = vmatprep.subr.bf16.mxu1 %v472_v0  ;;  %s439_s4 = scalar_lea.vmem %s259_s7, 128  ;;  %p444_p11 = scmp.lt.s32.totalorder %s259_s7, %s259_s7 }
  0x40   :  { %p440_p10 = scmp.ne.s32.totalorder %s259_s7, %s439_s4  ;;  %p445_p12 = scmp.lt.s32.totalorder %s439_s4, %s439_s4 }
  0x42   :  { %344 = vmatpush3.bf16.msra.mxu1 %v343_v14  ;;  %p446_p13 = por %p445_p12, %p444_p11 }
  0x43   :  { %345 = vmatprep.subr.bf16.mxu1 %v472_v0 }
  0x44   :  { %p447_p0 = pnand %p446_p13, %p440_p10 }
  0x46   :  { %347 = vmatpush3.bf16.msra.mxu1 %v346_v17 }
  0x47   :  { %348 = vmatprep.subr.bf16.mxu1 %v472_v0 }
  0x4a   :  { %350 = vmatpush3.bf16.msra.mxu1 %v349_v20 }
  0x4b   :  { %351 = vmatprep.subr.bf16.mxu1 %v472_v0 }
  0x4e   :  { %353 = vmatpush3.bf16.msra.mxu1 %v352_v23 }
  0x4f   :  { %354 = vmatprep.subr.bf16.mxu1 %v472_v0 }
  0x52   :  { %356 = vmatpush3.bf16.msra.mxu1 %v355_v26 }
  0x53   :  { %357 = vmatprep.subr.bf16.mxu1 %v472_v0 }
  0x56   :  { %359 = vmatpush3.bf16.msra.mxu1 %v358_v29 }
 0x110   :  { %v156_v31 = vpop.f32.mrb[0].mxu0 }
 0x111   :  { %v157_v32 = vadd.f32 %v268_v30, %v156_v31  ;;  %v297_v33 = vpop.f32.mrb[1].mxu0 }
 0x113   :  { %v160_v34 = vmax.f32 %v157_v32, 0.0 }
 0x115   :  { %331 = vmatmul.mubr.f32.vlgmr.msra.gmra.mrb[0].mxu1 %v160_v34 }
 0x1e8   :  { %v234_v38 = vpop.f32.mrb[0].mxu1 }
 0x1e9   :  { %v235_v39 = vadd.f32 %v270_v37, %v234_v38  ;;  %v332_v40 = vpop.f32.mrb[1].mxu1 }
 0x1eb   :  { %v241_v41 = vsel %vm240_vm2, %v235_v39, -1e+30 }
 0x1ec   :  { %242 = vmax.xlane.f32.xlu0 %v241_v41 }
 0x279   :  { %v243_v42 = vpop.xlane.xlu0 %242 }
 0x27a   :  { %v244_v43 = vsub.f32 %v241_v41, %v243_v42 }
 0x27c   :  { %v245_v44 = vmul.f32 1.442695, %v244_v43 }
 0x27e   :  { %369 = vpow2.f32 %v245_v44 }
 0x288   :  { %v370_v45 = vpop.eup %369 }
 0x289   :  { %247 = vadd.xlane.f32.xlu0 %v370_v45 }
 0x316   :  { %v248_v46 = vpop.xlane.xlu0 %247 }
 0x317   :  { %371 = vrcp.f32 %v248_v46 }
 0x321   :  { %v372_v47 = vpop.eup %371 }
 0x322   :  { %v250_v48 = vmul.f32 %v372_v47, %v370_v45 }
 0x324   :  { %251 = vst [vmem:[#allocation8] sm:$0xff] %v250_v48 }
 0x325   :  { %450 = shalt.err (!%p447_p0)
}
 0x326   :  { %s451_s10 = scalar_lea.hbm %s571_s5, 128 }
 0x327   :  { %p452_p1 = scmp.ne.s32.totalorder %s571_s5, %s451_s10  ;;  %p455_p2 = scmp.lt.u32.totalorder %s451_s10, %s571_s5 }
 0x329   :  { %p457_p3 = pnand %p455_p2, %p452_p1 }
 0x32b   :  { %460 = shalt.err (!%p457_p3)
}
 0x32c   :  { %261 = dma.vmem_to_hbm [thread:$0]  %s259_s7, 128, %s571_s5, [#allocation4]  }
 0x32d   :  { %465 = dma.done.wait [#allocation4], 128  }
 0x32e   :  { %466 = vsyncadd [#allocation4], 4294967168 }
 0x32f   :  { %265 = vsyncpa [#allocation3], 1 }
 0x330   :  { %266 = vsyncpa [#allocation6], 1 }
 0x331   :  { %267 = vsyncpa [#allocation4], 1 }

</bundles_post_ra>
